<compile_context>
chip_gen: v5e
topology: v5e:2x2
jax: 0.10.0
libtpu: 0.0.40
codegen_flags: <defaults>
</compile_context>

<pallas_src>
import functools

import jax
import jax.numpy as jnp
from jax.experimental import pallas as pl
from jax.experimental.pallas import tpu as pltpu


def _round_up(x, m):
    return (x + m - 1) // m * m


def _vmem_limit_bytes():
    # Re-derive the VMEM budget per generation (v7x has 64 MiB, v5e/v6e 128 MiB).
    try:
        cap = int(pltpu.get_tpu_info().vmem_capacity_bytes)
    except Exception:
        cap = 64 * 1024 * 1024
    return int(min(max(cap * 3 // 4, 32 * 1024 * 1024), 100 * 1024 * 1024))


def _separable_aspp_kernel(x_ref, wdw_ref, wpw_ref, shift_ref, mask_ref, o_ref,
                           *, k, dilation, padding, W, thw, n_tiles,
                           cin, cin_p, cout_p, use_mxu):
    # One (batch, spatial-tile) grid step.
    #   x_ref:     (1, cin_p, L)    flattened, zero-padded input (whole image; block
    #                               index constant in the tile axis -> DMA'd once per n)
    #   wdw_ref:   (cin_p, k*k)     depthwise weights, tap = kh*k + kw
    #   wpw_ref:   (cout_p, cin_p)  pointwise weights with BN scale folded in
    #   shift_ref: (cout_p, 1)      folded BN shift (beta - mean*scale)
    #   mask_ref:  (k, thw)         per-kw column-validity mask for this tile
    #   o_ref:     (1, cout_p, thw) lane-dense output tile
    if n_tiles == 1:
        base = 0  # static tap slices, no dynamic lane offsets
    else:
        base = pl.multiple_of(pl.program_id(1) * thw, 128)

    wdw = wdw_ref[...]      # load depthwise weights once, slice the value below
    cmask = mask_ref[...]

    # ---- depthwise conv: channels on sublanes, flat spatial tile on lanes ----
    dw = jnp.zeros((cin_p, thw), jnp.float32)
    for kw in range(k):
        acc = jnp.zeros((cin_p, thw), jnp.float32)
        for kh in range(k):
            off = kh * dilation * W + kw * dilation
            tap = kh * k + kw
            if n_tiles == 1:
                patch = x_ref[0, :, off:off + thw]
            else:
                patch = x_ref[0, :, pl.ds(base + off, thw)]
            acc = acc + patch * wdw[:, tap:tap + 1]
        if kw * dilation == padding:
            dw = dw + acc                              # mask statically all-ones: skip multiply
        else:
            dw = dw + acc * cmask[kw:kw + 1, :]

    # ---- pointwise 1x1 conv (BN scale already folded into wpw) ----
    if use_mxu:
        # MXU is bf16-native on v5e/v6e/v7x; keep the f32 accumulate.
        y = jnp.dot(wpw_ref[...], dw.astype(jnp.bfloat16),
                    preferred_element_type=jnp.float32)
    else:
        # tiny channel counts: broadcast MAC on the VPU (MXU would be ~idle).
        wpw = wpw_ref[...]
        y = jnp.zeros((cout_p, thw), jnp.float32)
        for c in range(cin):                           # padded channels are zero: skip
            y = y + wpw[:, c:c + 1] * dw[c:c + 1, :]

    # ---- folded BatchNorm shift (inference semantics) + ReLU ----
    y = jnp.maximum(y + shift_ref[...], 0.0)
    o_ref[0] = y.astype(o_ref.dtype)


def separable_aspp_forward(x_nchw, w_dw, w_pw, gamma, beta, run_mean, run_var,
                           *, kernel_size, padding, dilation, eps=1e-5):
    """x_nchw: (N, Cin, H, W); w_dw: (Cin, 1, k, k); w_pw: (Cout, Cin, 1, 1)."""
    N, Cin, H, W = x_nchw.shape
    Cout = w_pw.shape[0]
    k, p, d = kernel_size, padding, dilation

    # This kernel assumes stride=1 'same'-size output (the standard ASPP config).
    if 2 * p != (k - 1) * d:
        raise ValueError("separable_aspp_forward requires 2*padding == (k-1)*dilation "
                         f"(got padding={p}, kernel={k}, dilation={d})")

    HW = H * W
    HWp = _round_up(HW, 128)                      # lane-dense output stores
    thw = next(c for c in (1024, 512, 256, 128) if HWp % c == 0)   # spatial tile
    n_tiles = HWp // thw

    Cin_p = _round_up(Cin, 8)                     # sublane tile for f32
    Cout_p = _round_up(Cout, 8)
    use_mxu = Cin_p >= 64                         # MXU only worthwhile for real channel counts

    # Single merged pad: front = p*W (top H-pad) + p (flat column shift); back covers
    # the bottom H-pad plus every tap's maximum lane offset, rounded to 128 lanes.
    front = p * W + p
    max_off = (k - 1) * d * W + (k - 1) * d
    L = _round_up(max(front + HW, HWp + max_off), 128)

    x_flat = jnp.pad(
        x_nchw.astype(jnp.float32).reshape(N, Cin, HW),
        ((0, 0), (0, Cin_p - Cin), (front, L - front - HW)))        # (N, Cin_p, L)

    # Depthwise weights: (Cin_p, k*k), tap = kh*k + kw.
    wdw = jnp.pad(w_dw[:, 0, :, :].reshape(Cin, k * k).astype(jnp.float32),
                  ((0, Cin_p - Cin), (0, 0)))

    # Fold BN running stats: scale into the pointwise weights, shift separately.
    scale = gamma / jnp.sqrt(run_var + eps)                          # (Cout,)
    wpw_scaled = jnp.pad((w_pw[:, :, 0, 0] * scale[:, None]).astype(jnp.float32),
                         ((0, Cout_p - Cout), (0, Cin_p - Cin)))     # (Cout_p, Cin_p)
    if use_mxu:
        wpw_scaled = wpw_scaled.astype(jnp.bfloat16)
    shift = jnp.pad((beta - run_mean * scale).astype(jnp.float32).reshape(Cout, 1),
                    ((0, Cout_p - Cout), (0, 0)))                    # (Cout_p, 1)

    # Per-kw column-validity masks over the (padded) flat spatial axis.
    q = jnp.arange(HWp, dtype=jnp.int32)
    cols = q % W
    in_range = q < HW
    col_mask = jnp.stack(
        [(in_range & (cols + (kw * d - p) >= 0) & (cols + (kw * d - p) < W)
          ).astype(jnp.float32) for kw in range(k)], axis=0)         # (k, HWp)

    kernel = functools.partial(
        _separable_aspp_kernel, k=k, dilation=d, padding=p, W=W,
        thw=thw, n_tiles=n_tiles, cin=Cin, cin_p=Cin_p, cout_p=Cout_p,
        use_mxu=use_mxu)

    flops = 2 * N * HW * (Cin * k * k + Cout * Cin)
    bytes_accessed = int(4 * x_flat.size + 4 * N * Cout_p * HWp
                         + 4 * (wdw.size + shift.size + col_mask.size)
                         + wpw_scaled.size * wpw_scaled.dtype.itemsize)

    out_flat = pl.pallas_call(
        kernel,
        out_shape=jax.ShapeDtypeStruct((N, Cout_p, HWp), jnp.float32),
        grid_spec=pltpu.PrefetchScalarGridSpec(
            num_scalar_prefetch=0,
            grid=(N, n_tiles),
            in_specs=[
                pl.BlockSpec((1, Cin_p, L), lambda n, t: (n, 0, 0)),   # same block ∀ t -> one DMA per n
                pl.BlockSpec((Cin_p, k * k), lambda n, t: (0, 0)),
                pl.BlockSpec((Cout_p, Cin_p), lambda n, t: (0, 0)),
                pl.BlockSpec((Cout_p, 1), lambda n, t: (0, 0)),
                pl.BlockSpec((k, thw), lambda n, t: (0, t)),
            ],
            out_specs=pl.BlockSpec((1, Cout_p, thw), lambda n, t: (n, 0, t)),
        ),
        compiler_params=pltpu.CompilerParams(
            dimension_semantics=("parallel", "parallel"),
            vmem_limit_bytes=_vmem_limit_bytes()),
        cost_estimate=pl.CostEstimate(flops=flops, transcendentals=0,
                                      bytes_accessed=bytes_accessed),
    )(x_flat, wdw, wpw_scaled, shift, col_mask)

    # Drop channel/lane padding; (N, Cout, H*W) -> (N, Cout, H, W) is a free reshape.
    return out_flat[:, :Cout, :HW].reshape(N, Cout, H, W)


def _reference_forward(x_nchw, w_dw, w_pw, gamma, beta, run_mean, run_var,
                       *, kernel_size, padding, dilation, eps=1e-5):
    Cin = x_nchw.shape[1]
    dw = jax.lax.conv_general_dilated(
        x_nchw, w_dw, window_strides=(1, 1),
        padding=[(padding, padding), (padding, padding)],
        rhs_dilation=(dilation, dilation),
        feature_group_count=Cin,
        dimension_numbers=("NCHW", "OIHW", "NCHW"))
    pw = jax.lax.conv_general_dilated(
        dw, w_pw, window_strides=(1, 1), padding="VALID",
        dimension_numbers=("NCHW", "OIHW", "NCHW"))
    scale = gamma / jnp.sqrt(run_var + eps)
    shift = beta - run_mean * scale
    y = pw * scale[None, :, None, None] + shift[None, :, None, None]
    return jnp.maximum(y, 0.0)


if __name__ == "__main__":
    # Small shapes consistent with SeparableASPPModule(in=4, out=8, k=3, pad=2, dil=2)
    N, Cin, Cout, H, W = 2, 4, 8, 16, 16
    kernel_size, padding, dilation = 3, 2, 2

    key = jax.random.PRNGKey(0)
    kx, kdw, kpw, kg, kb, km, kv = jax.random.split(key, 7)

    x = jax.random.normal(kx, (N, Cin, H, W), jnp.float32)
    w_dw = jax.random.normal(kdw, (Cin, 1, kernel_size, kernel_size), jnp.float32) * 0.2
    w_pw = jax.random.normal(kpw, (Cout, Cin, 1, 1), jnp.float32) * 0.2
    gamma = 1.0 + 0.1 * jax.random.normal(kg, (Cout,), jnp.float32)
    beta = 0.1 * jax.random.normal(kb, (Cout,), jnp.float32)
    run_mean = 0.1 * jax.random.normal(km, (Cout,), jnp.float32)
    run_var = jnp.abs(1.0 + 0.1 * jax.random.normal(kv, (Cout,), jnp.float32))

    out = separable_aspp_forward(
        x, w_dw, w_pw, gamma, beta, run_mean, run_var,
        kernel_size=kernel_size, padding=padding, dilation=dilation)
    out = jax.block_until_ready(out)

    ref = _reference_forward(
        x, w_dw, w_pw, gamma, beta, run_mean, run_var,
        kernel_size=kernel_size, padding=padding, dilation=dilation)

    assert out.shape == (N, Cout, H, W)
    assert jnp.allclose(out, ref, atol=1e-4, rtol=1e-4), float(jnp.max(jnp.abs(out - ref)))

    print("KERNEL_OK")
</pallas_src>

<mosaic_0001>
module attributes {stable_mosaic.version = 11 : i64} {
  func.func @_separable_aspp_kernel(%arg0: i32, %arg1: i32, %arg2: memref<1x8x384xf32, #tpu.memory_space<vmem>>, %arg3: memref<8x9xf32, #tpu.memory_space<vmem>>, %arg4: memref<8x8xf32, #tpu.memory_space<vmem>>, %arg5: memref<8x1xf32, #tpu.memory_space<vmem>>, %arg6: memref<3x256xf32, #tpu.memory_space<vmem>>, %arg7: memref<1x8x256xf32, #tpu.memory_space<vmem>>) attributes {dimension_semantics = [#tpu.dimension_semantics<parallel>, #tpu.dimension_semantics<parallel>], iteration_bounds = array<i64: 2, 1>, scalar_prefetch = 0 : i64, scratch_operands = 0 : i64, tpu.core_type = #tpu.core_type<tc>, window_params = [{transform_indices = @transform_0, window_bounds = array<i64: 1, 8, 384>}, {pipeline_mode = #tpu.pipeline_mode<synchronous>, transform_indices = @transform_1, window_bounds = array<i64: 8, 9>}, {pipeline_mode = #tpu.pipeline_mode<synchronous>, transform_indices = @transform_2, window_bounds = array<i64: 8, 8>}, {pipeline_mode = #tpu.pipeline_mode<synchronous>, transform_indices = @transform_3, window_bounds = array<i64: 8, 1>}, {transform_indices = @transform_4, window_bounds = array<i64: 3, 256>}, {transform_indices = @transform_5, window_bounds = array<i64: 1, 8, 256>}]} {
    %c0 = arith.constant 0 : index
    %c0_0 = arith.constant 0 : index
    %0 = vector.load %arg3[%c0, %c0_0] : memref<8x9xf32, #tpu.memory_space<vmem>>, vector<8x9xf32>
    %c0_1 = arith.constant 0 : index
    %c0_2 = arith.constant 0 : index
    %1 = vector.load %arg6[%c0_1, %c0_2] : memref<3x256xf32, #tpu.memory_space<vmem>>, vector<3x256xf32>
    %cst = arith.constant 0.000000e+00 : f32
    %2 = vector.broadcast %cst : f32 to vector<8x256xf32>
    %cst_3 = arith.constant 0.000000e+00 : f32
    %3 = vector.broadcast %cst_3 : f32 to vector<8x256xf32>
    %c0_4 = arith.constant 0 : index
    %c0_5 = arith.constant 0 : index
    %c0_6 = arith.constant 0 : index
    %4 = vector.load %arg2[%c0_4, %c0_5, %c0_6] : memref<1x8x384xf32, #tpu.memory_space<vmem>>, vector<1x8x256xf32>
    %5 = vector.shape_cast %4 : vector<1x8x256xf32> to vector<8x256xf32>
    %6 = vector.extract_strided_slice %0 {offsets = [0, 0], sizes = [8, 1], strides = [1, 1]} : vector<8x9xf32> to vector<8x1xf32>
    %7 = vector.broadcast %6 : vector<8x1xf32> to vector<8x256xf32>
    %8 = arith.mulf %5, %7 : vector<8x256xf32>
    %9 = arith.addf %3, %8 : vector<8x256xf32>
    %c0_7 = arith.constant 0 : index
    %c0_8 = arith.constant 0 : index
    %c32 = arith.constant 32 : index
    %10 = vector.load %arg2[%c0_7, %c0_8, %c32] : memref<1x8x384xf32, #tpu.memory_space<vmem>>, vector<1x8x256xf32>
    %11 = vector.shape_cast %10 : vector<1x8x256xf32> to vector<8x256xf32>
    %12 = vector.extract_strided_slice %0 {offsets = [0, 3], sizes = [8, 1], strides = [1, 1]} : vector<8x9xf32> to vector<8x1xf32>
    %13 = vector.broadcast %12 : vector<8x1xf32> to vector<8x256xf32>
    %14 = arith.mulf %11, %13 : vector<8x256xf32>
    %15 = arith.addf %9, %14 : vector<8x256xf32>
    %c0_9 = arith.constant 0 : index
    %c0_10 = arith.constant 0 : index
    %c64 = arith.constant 64 : index
    %16 = vector.load %arg2[%c0_9, %c0_10, %c64] : memref<1x8x384xf32, #tpu.memory_space<vmem>>, vector<1x8x256xf32>
    %17 = vector.shape_cast %16 : vector<1x8x256xf32> to vector<8x256xf32>
    %18 = vector.extract_strided_slice %0 {offsets = [0, 6], sizes = [8, 1], strides = [1, 1]} : vector<8x9xf32> to vector<8x1xf32>
    %19 = vector.broadcast %18 : vector<8x1xf32> to vector<8x256xf32>
    %20 = arith.mulf %17, %19 : vector<8x256xf32>
    %21 = arith.addf %15, %20 : vector<8x256xf32>
    %22 = vector.extract_strided_slice %1 {offsets = [0, 0], sizes = [1, 256], strides = [1, 1]} : vector<3x256xf32> to vector<1x256xf32>
    %23 = vector.broadcast %22 : vector<1x256xf32> to vector<8x256xf32>
    %24 = arith.mulf %21, %23 : vector<8x256xf32>
    %25 = arith.addf %2, %24 : vector<8x256xf32>
    %cst_11 = arith.constant 0.000000e+00 : f32
    %26 = vector.broadcast %cst_11 : f32 to vector<8x256xf32>
    %c0_12 = arith.constant 0 : index
    %c0_13 = arith.constant 0 : index
    %c2 = arith.constant 2 : index
    %27 = vector.load %arg2[%c0_12, %c0_13, %c2] : memref<1x8x384xf32, #tpu.memory_space<vmem>>, vector<1x8x256xf32>
    %28 = vector.shape_cast %27 : vector<1x8x256xf32> to vector<8x256xf32>
    %29 = vector.extract_strided_slice %0 {offsets = [0, 1], sizes = [8, 1], strides = [1, 1]} : vector<8x9xf32> to vector<8x1xf32>
    %30 = vector.broadcast %29 : vector<8x1xf32> to vector<8x256xf32>
    %31 = arith.mulf %28, %30 : vector<8x256xf32>
    %32 = arith.addf %26, %31 : vector<8x256xf32>
    %c0_14 = arith.constant 0 : index
    %c0_15 = arith.constant 0 : index
    %c34 = arith.constant 34 : index
    %33 = vector.load %arg2[%c0_14, %c0_15, %c34] : memref<1x8x384xf32, #tpu.memory_space<vmem>>, vector<1x8x256xf32>
    %34 = vector.shape_cast %33 : vector<1x8x256xf32> to vector<8x256xf32>
    %35 = vector.extract_strided_slice %0 {offsets = [0, 4], sizes = [8, 1], strides = [1, 1]} : vector<8x9xf32> to vector<8x1xf32>
    %36 = vector.broadcast %35 : vector<8x1xf32> to vector<8x256xf32>
    %37 = arith.mulf %34, %36 : vector<8x256xf32>
    %38 = arith.addf %32, %37 : vector<8x256xf32>
    %c0_16 = arith.constant 0 : index
    %c0_17 = arith.constant 0 : index
    %c66 = arith.constant 66 : index
    %39 = vector.load %arg2[%c0_16, %c0_17, %c66] : memref<1x8x384xf32, #tpu.memory_space<vmem>>, vector<1x8x256xf32>
    %40 = vector.shape_cast %39 : vector<1x8x256xf32> to vector<8x256xf32>
    %41 = vector.extract_strided_slice %0 {offsets = [0, 7], sizes = [8, 1], strides = [1, 1]} : vector<8x9xf32> to vector<8x1xf32>
    %42 = vector.broadcast %41 : vector<8x1xf32> to vector<8x256xf32>
    %43 = arith.mulf %40, %42 : vector<8x256xf32>
    %44 = arith.addf %38, %43 : vector<8x256xf32>
    %45 = arith.addf %25, %44 : vector<8x256xf32>
    %cst_18 = arith.constant 0.000000e+00 : f32
    %46 = vector.broadcast %cst_18 : f32 to vector<8x256xf32>
    %c0_19 = arith.constant 0 : index
    %c0_20 = arith.constant 0 : index
    %c4 = arith.constant 4 : index
    %47 = vector.load %arg2[%c0_19, %c0_20, %c4] : memref<1x8x384xf32, #tpu.memory_space<vmem>>, vector<1x8x256xf32>
    %48 = vector.shape_cast %47 : vector<1x8x256xf32> to vector<8x256xf32>
    %49 = vector.extract_strided_slice %0 {offsets = [0, 2], sizes = [8, 1], strides = [1, 1]} : vector<8x9xf32> to vector<8x1xf32>
    %50 = vector.broadcast %49 : vector<8x1xf32> to vector<8x256xf32>
    %51 = arith.mulf %48, %50 : vector<8x256xf32>
    %52 = arith.addf %46, %51 : vector<8x256xf32>
    %c0_21 = arith.constant 0 : index
    %c0_22 = arith.constant 0 : index
    %c36 = arith.constant 36 : index
    %53 = vector.load %arg2[%c0_21, %c0_22, %c36] : memref<1x8x384xf32, #tpu.memory_space<vmem>>, vector<1x8x256xf32>
    %54 = vector.shape_cast %53 : vector<1x8x256xf32> to vector<8x256xf32>
    %55 = vector.extract_strided_slice %0 {offsets = [0, 5], sizes = [8, 1], strides = [1, 1]} : vector<8x9xf32> to vector<8x1xf32>
    %56 = vector.broadcast %55 : vector<8x1xf32> to vector<8x256xf32>
    %57 = arith.mulf %54, %56 : vector<8x256xf32>
    %58 = arith.addf %52, %57 : vector<8x256xf32>
    %c0_23 = arith.constant 0 : index
    %c0_24 = arith.constant 0 : index
    %c68 = arith.constant 68 : index
    %59 = vector.load %arg2[%c0_23, %c0_24, %c68] : memref<1x8x384xf32, #tpu.memory_space<vmem>>, vector<1x8x256xf32>
    %60 = vector.shape_cast %59 : vector<1x8x256xf32> to vector<8x256xf32>
    %61 = vector.extract_strided_slice %0 {offsets = [0, 8], sizes = [8, 1], strides = [1, 1]} : vector<8x9xf32> to vector<8x1xf32>
    %62 = vector.broadcast %61 : vector<8x1xf32> to vector<8x256xf32>
    %63 = arith.mulf %60, %62 : vector<8x256xf32>
    %64 = arith.addf %58, %63 : vector<8x256xf32>
    %65 = vector.extract_strided_slice %1 {offsets = [2, 0], sizes = [1, 256], strides = [1, 1]} : vector<3x256xf32> to vector<1x256xf32>
    %66 = vector.broadcast %65 : vector<1x256xf32> to vector<8x256xf32>
    %67 = arith.mulf %64, %66 : vector<8x256xf32>
    %68 = arith.addf %45, %67 : vector<8x256xf32>
    %c0_25 = arith.constant 0 : index
    %c0_26 = arith.constant 0 : index
    %69 = vector.load %arg4[%c0_25, %c0_26] : memref<8x8xf32, #tpu.memory_space<vmem>>, vector<8x8xf32>
    %cst_27 = arith.constant 0.000000e+00 : f32
    %70 = vector.broadcast %cst_27 : f32 to vector<8x256xf32>
    %71 = vector.extract_strided_slice %69 {offsets = [0, 0], sizes = [8, 1], strides = [1, 1]} : vector<8x8xf32> to vector<8x1xf32>
    %72 = vector.extract_strided_slice %68 {offsets = [0, 0], sizes = [1, 256], strides = [1, 1]} : vector<8x256xf32> to vector<1x256xf32>
    %73 = vector.broadcast %71 : vector<8x1xf32> to vector<8x256xf32>
    %74 = vector.broadcast %72 : vector<1x256xf32> to vector<8x256xf32>
    %75 = arith.mulf %73, %74 : vector<8x256xf32>
    %76 = arith.addf %70, %75 : vector<8x256xf32>
    %77 = vector.extract_strided_slice %69 {offsets = [0, 1], sizes = [8, 1], strides = [1, 1]} : vector<8x8xf32> to vector<8x1xf32>
    %78 = vector.extract_strided_slice %68 {offsets = [1, 0], sizes = [1, 256], strides = [1, 1]} : vector<8x256xf32> to vector<1x256xf32>
    %79 = vector.broadcast %77 : vector<8x1xf32> to vector<8x256xf32>
    %80 = vector.broadcast %78 : vector<1x256xf32> to vector<8x256xf32>
    %81 = arith.mulf %79, %80 : vector<8x256xf32>
    %82 = arith.addf %76, %81 : vector<8x256xf32>
    %83 = vector.extract_strided_slice %69 {offsets = [0, 2], sizes = [8, 1], strides = [1, 1]} : vector<8x8xf32> to vector<8x1xf32>
    %84 = vector.extract_strided_slice %68 {offsets = [2, 0], sizes = [1, 256], strides = [1, 1]} : vector<8x256xf32> to vector<1x256xf32>
    %85 = vector.broadcast %83 : vector<8x1xf32> to vector<8x256xf32>
    %86 = vector.broadcast %84 : vector<1x256xf32> to vector<8x256xf32>
    %87 = arith.mulf %85, %86 : vector<8x256xf32>
    %88 = arith.addf %82, %87 : vector<8x256xf32>
    %89 = vector.extract_strided_slice %69 {offsets = [0, 3], sizes = [8, 1], strides = [1, 1]} : vector<8x8xf32> to vector<8x1xf32>
    %90 = vector.extract_strided_slice %68 {offsets = [3, 0], sizes = [1, 256], strides = [1, 1]} : vector<8x256xf32> to vector<1x256xf32>
    %91 = vector.broadcast %89 : vector<8x1xf32> to vector<8x256xf32>
    %92 = vector.broadcast %90 : vector<1x256xf32> to vector<8x256xf32>
    %93 = arith.mulf %91, %92 : vector<8x256xf32>
    %94 = arith.addf %88, %93 : vector<8x256xf32>
    %c0_28 = arith.constant 0 : index
    %c0_29 = arith.constant 0 : index
    %95 = vector.load %arg5[%c0_28, %c0_29] : memref<8x1xf32, #tpu.memory_space<vmem>>, vector<8x1xf32>
    %96 = vector.broadcast %95 : vector<8x1xf32> to vector<8x256xf32>
    %97 = arith.addf %94, %96 : vector<8x256xf32>
    %cst_30 = arith.constant 0.000000e+00 : f32
    %98 = vector.broadcast %cst_30 : f32 to vector<8x256xf32>
    %99 = arith.maximumf %97, %98 : vector<8x256xf32>
    %c0_31 = arith.constant 0 : index
    %c0_32 = arith.constant 0 : index
    %c0_33 = arith.constant 0 : index
    %100 = vector.load %arg7[%c0_31, %c0_32, %c0_33] : memref<1x8x256xf32, #tpu.memory_space<vmem>>, vector<1x8x256xf32>
    %101 = vector.shape_cast %100 : vector<1x8x256xf32> to vector<8x256xf32>
    %102 = vector.shape_cast %99 : vector<8x256xf32> to vector<1x8x256xf32>
    tpu.vector_store %arg7[%c0_31, %c0_32, %c0_33], %102 {strides = array<i32>} : memref<1x8x256xf32, #tpu.memory_space<vmem>>, vector<1x8x256xf32>,
    return
  }
  func.func @transform_0(%arg0: i32, %arg1: i32) -> (i32, i32, i32) {
    %c0_i32 = arith.constant 0 : i32
    %c0_i32_0 = arith.constant 0 : i32
    %c0_i32_1 = arith.constant 0 : i32
    return %arg0, %c0_i32, %c0_i32_0 : i32, i32, i32
  }
  func.func @transform_1(%arg0: i32, %arg1: i32) -> (i32, i32) {
    %c0_i32 = arith.constant 0 : i32
    %c0_i32_0 = arith.constant 0 : i32
    %c0_i32_1 = arith.constant 0 : i32
    return %c0_i32, %c0_i32_0 : i32, i32
  }
  func.func @transform_2(%arg0: i32, %arg1: i32) -> (i32, i32) {
    %c0_i32 = arith.constant 0 : i32
    %c0_i32_0 = arith.constant 0 : i32
    %c0_i32_1 = arith.constant 0 : i32
    return %c0_i32, %c0_i32_0 : i32, i32
  }
  func.func @transform_3(%arg0: i32, %arg1: i32) -> (i32, i32) {
    %c0_i32 = arith.constant 0 : i32
    %c0_i32_0 = arith.constant 0 : i32
    %c0_i32_1 = arith.constant 0 : i32
    return %c0_i32, %c0_i32_0 : i32, i32
  }
  func.func @transform_4(%arg0: i32, %arg1: i32) -> (i32, i32) {
    %c0_i32 = arith.constant 0 : i32
    %c0_i32_0 = arith.constant 0 : i32
    return %c0_i32, %arg1 : i32, i32
  }
  func.func @transform_5(%arg0: i32, %arg1: i32) -> (i32, i32, i32) {
    %c0_i32 = arith.constant 0 : i32
    %c0_i32_0 = arith.constant 0 : i32
    return %arg0, %c0_i32, %arg1 : i32, i32, i32
  }
}

</mosaic_0001>

<bundles_post_ra>
// kernel: tpu_custom_call.1
= control target key start
LH: loop header
LB: loop body
LE: loop exit
PB: predicated region body
PF: predicated region fallthrough
CT: control target
= control target key end

     0   :  { %10 = vsyncpa [#allocation3], 0  ;;  %s1311_s0 = inlined_call_operand.hbm [shape: f32[2,8,384], index: 0, kind: input, shape index: {}]   ;;  %s1312_s1 = inlined_call_operand.vmem [shape: f32[8,9], index: 1, kind: input, shape index: {}]   ;;  %s1313_s2 = inlined_call_operand.hbm [shape: f32[8,8], index: 2, kind: input, shape index: {}]   ;;  %s1314_s3 = inlined_call_operand.vmem [shape: f32[8,1], index: 3, kind: input, shape index: {}]   ;;  %s1315_s4 = inlined_call_operand.hbm [shape: f32[3,256], index: 4, kind: input, shape index: {}]   ;;  %s1316_s5 = inlined_call_operand.hbm [shape: f32[2,8,256], index: 5, kind: output, shape index: {}]  }
   0x1   :  { %12 = vsyncpa [#allocation3 + $0x1], 0 }
   0x2   :  { %13 = vsyncpa [#allocation6], 0 }
   0x3   :  { %14 = vsyncpa [#allocation4], 0 }
   0x4   :  { %16 = vsyncpa [#allocation4 + $0x1], 0  ;;  %s1066_s18 = smov 0   ;;  %s1068_s19 = smov 0  }
   0x5   :  { %s1070_s20 = smov 0   ;;  %s1072_s21 = smov 0  }
   0x6   :  { %s1074_s22 = smov 0   ;;  %s1076_s23 = smov 0  }
   0x7 LB: > { %s712_s24 = sadd.s32 4294967295, %s1018_s23   ;;  %s713_s25 = sadd.s32 4294967294, %s1018_s23   ;;  %s1018_s23 = sphi %s1076_s23, %s22_s23   ;;  %s1014_s22 = sphi %s1074_s22, %s1327_s22   ;;  %s1010_s21 = sphi %s1072_s21, %s1326_s21   ;;  %s1006_s20 = sphi %s1070_s20, %s1325_s20   ;;  %s1002_s19 = sphi %s1068_s19, %s1324_s19   ;;  %s998_s18 = sphi %s1066_s18, %s1323_s18  }
   0x8   : > { %p54_p0 = scmp.ne.s32.totalorder %s1002_s19, %s998_s18  ;;  %p1100_p1 = scmp.eq.s32.totalorder %s712_s24, 0 }
   0x9   : > { %p1104_p2 = scmp.eq.s32.totalorder %s712_s24, 1  ;;  %p175_p3 = scmp.eq.s32.totalorder %s713_s25, 1 }
   0xa   : > { %p1110_p4 = por %p1100_p1, %p54_p0  ;;  %p714_p5 = scmp.ge.s32.totalorder %s1018_s23, 1 }
   0xb   : > { %p1115_p6 = por %p175_p3, %p54_p0  ;;  %p182_p7 = scmp.lt.s32.totalorder %s1018_s23, 3 }
   0xc   : > { %s197_s7 = sshll.u32 %s1313_s2, 4  ;;  %p717_p9 = scmp.ge.s32.totalorder %s1018_s23, 2  ;;  %s198_s7 = int_to_ptr.hbm [resolvable:$true] %s197_s7 }
   0xd   : > { %p1123_p8 = pnand %p714_p5, %p182_p7  ;;  %s1020_s9 = smov [#allocation5]  }
   0xe   : > { %s199_s10 = sshll.u32 %s1020_s9, 4  ;;  %s215_s13 = sshll.u32 %s1315_s4, 4  ;;  %s200_s10 = int_to_ptr.vmem [resolvable:$true] %s199_s10  ;;  %s216_s13 = int_to_ptr.hbm [resolvable:$true] %s215_s13 }
   0xf   : > { %p744_p10 = pneg %p1123_p8  ;;  %s1021_s14 = smov [#allocation7]  }
  0x10   : > { %s217_s15 = sshll.u32 %s1021_s14, 4  ;;  %s34_s16 = sadd.s32 1, %s1014_s22  ;;  %s218_s15 = int_to_ptr.vmem [resolvable:$true] %s217_s15 }
  0x11   : > { %p745_p11 = pnand %p744_p10, %p1100_p1  ;;  %s41_s17 = sadd.s32 1, %s1006_s20 }
  0x12   : > { %p36_p12 = scmp.ge.s32.totalorder %s34_s16, 2  ;;  %p48_p13 = scmp.ne.s32.totalorder %s1006_s20, %s1002_s19 }
  0x13   : > { %747 = dma.hbm_to_vmem [thread:$0]  (!%p745_p11), %s198_s7, 128, %s200_s10, [#allocation6]  }
  0x14   : > { %750 = dma.hbm_to_vmem [thread:$0]  (!%p745_p11), %s216_s13, 128, %s218_s15, [#allocation6]  }
  0x15   : > { %p49_p0 = scmp.eq.s32.totalorder %s1018_s23, 0  ;;  %p761_p3 = scmp.lt.s32.totalorder %s1018_s23, 2 }
  0x16   : > { %s1329_s16 = smov (%p36_p12, %s34_s16), 0  ;;  %p1145_p7 = por %p1104_p2, %p48_p13 }
  0x17   : > { %p50_p5 = por %p49_p0, %p48_p13  ;;  %s38_s25 = ssub.s32 %s1014_s22, %s1329_s16 }
  0x18   : > { %s228_s30 = sand.u32 1, %s1006_s20   ;;  %p39_p10 = scmp.eq.s32.totalorder %s38_s25, 0 }
  0x19   : > { %s729_s6 = smul.u32 24, %s228_s30  ;;  %p752_p11 = pnand %p761_p3, %p50_p5 }
  0x1a   : > { %s1153_s7 = scalar_select %p39_p10, %s1006_s20, %s41_s17  }
  0x1b   : > { %s730_s9 = smul.u32 24, %s1014_s22  ;;  %s232_s10 = scalar_lea.vmem [#allocation2], %s729_s6 }
  0x1c   : > { %s241_s11 = sshll.u32 %s232_s10, 4  ;;  %s229_s15 = scalar_lea.sflag [#allocation3], %s228_s30  ;;  %s242_s11 = int_to_ptr.vmem [resolvable:$true] %s241_s11 }
  0x1d   : > { %s237_s14 = scalar_lea.hbm %s1311_s0, %s730_s9  ;;  %250 = sbr.rel (%p1123_p8) target bundleno = 479 (0x1df), region = 40 }
  0x1e   : > { %s239_s27 = sshll.u32 %s237_s14, 4  ;;  %s1162_s25 = sand.u32 (!%p1123_p8), 1, %s1002_s19   ;;  %s240_s27 = int_to_ptr.hbm [resolvable:$true] %s239_s27 }
  0x1f   : > { %754 = dma.hbm_to_vmem [thread:$0]  (!%p752_p11), %s240_s27, 384, %s242_s11, %s229_s15  }
  0x20   : > { %s731_s17 = smul.u32 (!%p1123_p8), 24, %s1162_s25  ;;  %s253_s6 = scalar_lea.sflag (!%p1123_p8), [#allocation3], %s1162_s25 }
  0x22   : > { %s1166_s10 = scalar_lea.vmem [#allocation2], %s731_s17 }
  0x23   : > { %985 = dma.done.wait (%p1110_p4), %s253_s6, 384  }
  0x24   : > { %987 = vsyncadd (%p1110_p4), %s253_s6, 4294966912 }
  0x25   : > { %989 = dma.done.wait (%p1100_p1), [#allocation6], 256  }
  0x26   : > { %991 = vsyncadd (%p1100_p1), [#allocation6], 4294967040  ;;  %v1022_v0 = vmov 7   ;;  %v1023_v1 = vmov 0   ;;  %v1024_v2 = vmov 4   ;;  %v296_v3 = vld [vmem:[%s1312_s1] sm:$0xff] }
  0x27   : > { %833 = vset.pattern.permute.xlu1 %v1022_v0  ;;  %829 = vset.pattern.permute.xlu0 %v1023_v1  ;;  %v1025_v4 = vmov 6   ;;  %v1026_v5 = vmov 3   ;;  %v1027_v6 = vmov 5   ;;  %v1028_v7 = vmov 8   ;;  %v1185_v12 = vld [vmem:[%s1166_s10 + $0x10] sm:$0xff]  ;;  %v1188_v13 = vld [vmem:[%s1166_s10] sm:$0xff] }
  0x28   : > { %831 = vset.pattern.permute.xlu2 %v1024_v2  ;;  %404 = vperm.xlu1 %833, %v296_v3   ;;  %v1029_v8 = vmov 1   ;;  %v1030_v9 = vmov 2   ;;  %s1031_s26 = smov 64   ;;  %s1032_s28 = smov 96   ;;  %v1197_v20 = vld [vmem:[%s1166_s10 + $0x8] sm:$0xff]  ;;  %vm328_vm0 = vcmask 785408  }
  0x29   : > { %302 = vperm.xlu0 %829, %v296_v3   ;;  %380 = vperm.xlu2 %831, %v296_v3   ;;  %v1220_v35 = vld [vmem:[#allocation7] sm:$0x77]  ;;  %s1033_s9 = smov 4   ;;  %vm351_vm1 = vcmask 523264   ;;  %s1034_s11 = smov 126   ;;  %vm513_vm2 = vcmask 31744  }
  0x2a   : > { %v501_v36 = vperm.slane %v1220_v35, 2  ;;  %v502_v37 = vperm.slane %v1220_v35, 6  ;;  %s1035_s12 = smov 124   ;;  %vm436_vm3 = vcmask 1031168   ;;  %vm530_vm4 = vcmask 1014784   ;;  %s722_s27 = sshll.u32 %s1162_s25, 4 }
  0x2b   : > { %s728_s15 = sshll.u32 %s1010_s21, 4  ;;  %s293_s8 = scalar_lea.vmem [#allocation8], %s722_s27 }
  0x2c   : > { %v505_v38 = vperm.slane %v501_v36, 2  ;;  %v506_v39 = vperm.slane %v502_v37, 2  ;;  %s605_s10 = scalar_lea.hbm %s1316_s5, %s728_s15  ;;  %s607_s30 = sshll.u32 %s293_s8, 4  ;;  %s608_s30 = int_to_ptr.vmem [resolvable:$true] %s607_s30 }
  0x2d   : > { %s592_s21 = scalar_lea.sflag [#allocation4], %s1162_s25  ;;  %s952_s13 = scalar_lea.hbm %s1316_s5, 32 }
  0x30   : > { %835 = vset.pattern.permute.xlu1 %v1025_v4 }
  0x31   : > { %830 = vset.pattern.permute.xlu0 %v1026_v5  ;;  %336 = vperm.xlu1 %835, %v296_v3  }
  0x32   : > { %313 = vperm.xlu0 %830, %v296_v3   ;;  %832 = vset.pattern.permute.xlu2 %v1027_v6 }
  0x33   : > { %454 = vperm.xlu2 %832, %v296_v3  }
  0x39   : > { %838 = vset.pattern.permute.xlu1 %v1023_v1 }
  0x3a   : > { %837 = vset.pattern.permute.xlu0 %v1030_v9 }
  0x3b   : > { %834 = vset.pattern.permute.xlu2 %v1028_v7  ;;  %444 = vperm.xlu0 %837, %v296_v3  }
  0x3c   : > { %478 = vperm.xlu2 %834, %v296_v3  }
  0x44   : > { %836 = vset.pattern.permute.xlu2 %v1029_v8 }
  0x45   : > { %370 = vperm.xlu2 %836, %v296_v3  }
  0x83   : > { %v381_v19 = vpop.permute.xlu2 %380 }
  0x84   : > { %v384_v21 = vmul.f32 %v381_v19, %v1197_v20  ;;  %v383_v28 = vmul.f32 %v381_v19, %v1188_v13  ;;  %v385_v34 = vmul.f32 %v381_v19, %v1185_v12 }
  0x8d   : > { %v455_v24 = vpop.permute.xlu2 %454 }
  0x8e   : > { %v457_v26 = vmul.f32 %v455_v24, %v1188_v13  ;;  %v458_v27 = vmul.f32 %v455_v24, %v1197_v20  ;;  %v459_v40 = vmul.f32 %v455_v24, %v1185_v12  ;;  %v537_v24 = vld [vmem:[#allocation5] sm:$0xff] }
  0x96   : > { %v479_v31 = vpop.permute.xlu2 %478 }
  0x97   : > { %v481_v32 = vmul.f32 %v479_v31, %v1188_v13  ;;  %v482_v33 = vmul.f32 %v479_v31, %v1197_v20  ;;  %v483_v42 = vmul.f32 %v479_v31, %v1185_v12 }
  0x9a   : > { %v405_v11 = vpop.permute.xlu1 %404 }
  0x9b   : > { %v1182_v10 = vpop.permute.xlu0 %302  ;;  %v407_v29 = vmul.f32 %v405_v11, %v1188_v13  ;;  %v408_v30 = vmul.f32 %v405_v11, %v1197_v20  ;;  %v409_v41 = vmul.f32 %v405_v11, %v1185_v12 }
  0x9c   : > { %v305_v49 = vmul.f32 %v1182_v10, %v1188_v13  ;;  %v306_v50 = vmul.f32 %v1182_v10, %v1197_v20 }
  0x9f   : > { %v371_v43 = vpop.permute.xlu2 %370 }
  0xa0   : > { %v373_v2 = vmul.f32 %v371_v43, %v1188_v13 }
  0xa3   : > { %v337_v14 = vpop.permute.xlu1 %336 }
  0xa4   : > { %v314_v15 = vpop.permute.xlu0 %313  ;;  %v339_v16 = vmul.f32 %v337_v14, %v1188_v13  ;;  %v340_v22 = vmul.f32 %v337_v14, %v1197_v20  ;;  %v341_v25 = vmul.f32 %v337_v14, %v1185_v12 }
  0xa5   : > { %v316_v17 = vmul.f32 %v314_v15, %v1188_v13  ;;  %v318_v18 = vmul.f32 %v314_v15, %v1185_v12  ;;  %v317_v23 = vmul.f32 %v314_v15, %v1197_v20 }
  0xa6   : > { %345 = vrot.lane.b32.xlu2 %v339_v16, %s1031_s26 }
  0xa7   : > { %322 = vrot.lane.b32.xlu1 %v316_v17, %s1032_s28  ;;  %326 = vrot.lane.b32.xlu0 %v318_v18, %s1032_s28 }
  0xad   : > { %v445_v45 = vpop.permute.xlu0 %444 }
  0xae   : > { %391 = vrot.lane.b32.xlu2 %v384_v21, %s1032_s28  ;;  %v447_v14 = vmul.f32 %v445_v45, %v1188_v13  ;;  %v448_v36 = vmul.f32 %v445_v45, %v1197_v20 }
  0xaf   : > { %324 = vrot.lane.b32.xlu1 %v317_v23, %s1032_s28  ;;  %347 = vrot.lane.b32.xlu0 %v340_v22, %s1031_s26 }
  0xb6   : > { %463 = vrot.lane.b32.xlu2 %v457_v26, %s1032_s28 }
  0xb7   : > { %349 = vrot.lane.b32.xlu1 %v341_v25, %s1031_s26  ;;  %465 = vrot.lane.b32.xlu0 %v458_v27, %s1032_s28  ;;  %v375_v25 = vmul.f32 %v371_v43, %v1185_v12  ;;  %v374_v27 = vmul.f32 %v371_v43, %v1197_v20 }
  0xbe   : > { %413 = vrot.lane.b32.xlu2 %v407_v29, %s1031_s26 }
  0xbf   : > { %389 = vrot.lane.b32.xlu1 %v383_v28, %s1032_s28  ;;  %415 = vrot.lane.b32.xlu0 %v408_v30, %s1031_s26 }
  0xc6   : > { %487 = vrot.lane.b32.xlu2 %v481_v32, %s1031_s26 }
  0xc7   : > { %393 = vrot.lane.b32.xlu1 %v385_v34, %s1032_s28  ;;  %489 = vrot.lane.b32.xlu0 %v482_v33, %s1031_s26  ;;  %v449_v33 = vmul.f32 %v445_v45, %v1185_v12  ;;  %v359_v45 = vperm.slane %v1220_v35, 0 }
  0xce   : > { %509 = vrot.lane.b32.xlu2 %v505_v38, %s1033_s9 }
  0xcf   : > { %467 = vrot.lane.b32.xlu1 %v459_v40, %s1032_s28  ;;  %511 = vrot.lane.b32.xlu0 %v506_v39, %s1033_s9 }
  0xd7   : > { %417 = vrot.lane.b32.xlu1 %v409_v41, %s1031_s26 }
  0xdf   : > { %491 = vrot.lane.b32.xlu1 %v483_v42, %s1031_s26  ;;  %s609_s26 = sshll.u32 %s605_s10, 4  ;;  %s610_s26 = int_to_ptr.hbm [resolvable:$true] %s609_s26 }
  0xe0   : > { %s946_s28 = sshra.s32 %s610_s26, 4  ;;  %s947_s28 = int_to_ptr.hbm [resolvable:$true] %s946_s28 }
  0xe1   : > { %s948_s9 = scalar_lea.hbm %s947_s28, 16  ;;  %p953_p8 = scmp.lt.s32.totalorder %s947_s28, %s1316_s5 }
  0xe2   : > { %p949_p1 = scmp.ne.s32.totalorder %s947_s28, %s948_s9  ;;  %p954_p12 = scmp.lt.s32.totalorder %s952_s13, %s948_s9 }
  0xe4   : > { %p950_p2 = pnand %p949_p1, %p1145_p7  ;;  %p955_p13 = por %p954_p12, %p953_p8 }
  0xe6   : > { %p951_p4 = pneg %p950_p2 }
  0xe8   : > { %p956_p0 = pnand %p955_p13, %p951_p4 }
 0x100   : > { %v346_v44 = vpop.permute.xlu2 %345 }
 0x108   : > { %v392_v46 = vpop.permute.xlu2 %391 }
 0x110   : > { %v464_v51 = vpop.permute.xlu2 %463 }
 0x118   : > { %v414_v63 = vpop.permute.xlu2 %413 }
 0x119   : > { %v323_v47 = vpop.permute.xlu1 %322  ;;  %v327_v48 = vpop.permute.xlu0 %326 }
 0x120   : > { %v488_v7 = vpop.permute.xlu2 %487 }
 0x121   : > { %v325_v52 = vpop.permute.xlu1 %324  ;;  %v348_v55 = vpop.permute.xlu0 %347 }
 0x122   : > { %v329_v53 = vsel %vm328_vm0, %v323_v47, %v325_v52  ;;  %v330_v54 = vsel %vm328_vm0, %v325_v52, %v327_v48  ;;  %v352_v58 = vsel %vm351_vm1, %v346_v44, %v348_v55 }
 0x123   : > { %v333_v56 = vadd.f32 %v329_v53, %v305_v49  ;;  %v334_v57 = vadd.f32 %v330_v54, %v306_v50  ;;  %v360_v49 = vperm.slane %v1220_v35, 4  ;;  %v363_v50 = vperm.slane %v359_v45, 0 }
 0x125   : > { %v1240_v59 = vadd.f32 %v352_v58, %v333_v56  ;;  %v364_v54 = vperm.slane %v360_v49, 0 }
 0x128   : > { %v510_v19 = vpop.permute.xlu2 %509 }
 0x129   : > { %v350_v60 = vpop.permute.xlu1 %349  ;;  %v466_v62 = vpop.permute.xlu0 %465 }
 0x12a   : > { %v353_v61 = vsel %vm351_vm1, %v348_v55, %v350_v60  ;;  %v469_v11 = vsel %vm328_vm0, %v464_v51, %v466_v62  ;;  %v365_v55 = vmul.f32 %v363_v50, %v1240_v59 }
 0x12b   : > { %v1243_v0 = vadd.f32 %v353_v61, %v334_v57  ;;  %v474_v16 = vadd.f32 %v469_v11, %v447_v14 }
 0x12d   : > { %v366_v60 = vmul.f32 %v364_v54, %v1243_v0 }
 0x131   : > { %v390_v3 = vpop.permute.xlu1 %389  ;;  %v416_v6 = vpop.permute.xlu0 %415 }
 0x132   : > { %v395_v4 = vsel %vm328_vm0, %v390_v3, %v392_v46  ;;  %v419_v9 = vsel %vm351_vm1, %v414_v63, %v416_v6 }
 0x133   : > { %v400_v8 = vadd.f32 %v395_v4, %v373_v2 }
 0x135   : > { %v424_v10 = vadd.f32 %v419_v9, %v400_v8 }
 0x137   : > { %430 = vrot.lane.b32.xlu1 %v424_v10, %s1034_s11 }
 0x139   : > { %v394_v15 = vpop.permute.xlu1 %393  ;;  %v490_v17 = vpop.permute.xlu0 %489 }
 0x13a   : > { %v493_v18 = vsel %vm351_vm1, %v488_v7, %v490_v17  ;;  %v396_v26 = vsel %vm328_vm0, %v392_v46, %v394_v15  ;;  %v402_v13 = vadd.f32 %v394_v15, %v375_v25 }
 0x13b   : > { %v498_v21 = vadd.f32 %v493_v18, %v474_v16  ;;  %v401_v28 = vadd.f32 %v396_v26, %v374_v27 }
 0x13d   : > { %v518_v22 = vmul.f32 %v510_v19, %v498_v21 }
 0x13f   : > { %524 = vrot.lane.b32.xlu1 %v518_v22, %s1035_s12 }
 0x141   : > { %v468_v23 = vpop.permute.xlu1 %467  ;;  %v512_v39 = vpop.permute.xlu0 %511 }
 0x142   : > { %v470_v34 = vsel %vm328_vm0, %v466_v62, %v468_v23  ;;  %v476_v37 = vadd.f32 %v468_v23, %v449_v33  ;;  %v514_v44 = vsel %vm513_vm2, %v510_v19, %v512_v39 }
 0x143   : > { %v475_v38 = vadd.f32 %v470_v34, %v448_v36 }
 0x147   : > { %540 = vperm.xlu1 %838, %v537_v24  }
 0x149   : > { %v418_v29 = vpop.permute.xlu1 %417 }
 0x14a   : > { %v420_v30 = vsel %vm351_vm1, %v416_v6, %v418_v29  ;;  %v426_v31 = vadd.f32 %v418_v29, %v402_v13 }
 0x14b   : > { %v425_v32 = vadd.f32 %v420_v30, %v401_v28 }
 0x14c   : > { %434 = vrot.lane.b32.xlu0 %v426_v31, %s1034_s11 }
 0x14d   : > { %432 = vrot.lane.b32.xlu2 %v425_v32, %s1034_s11 }
 0x14f   : > { %839 = vset.pattern.permute.xlu1 %v1026_v5  ;;  %v579_v5 = vld [vmem:[%s1314_s3] sm:$0xff] }
 0x150   : > { %570 = vperm.xlu1 %839, %v537_v24  }
 0x151   : > { %v492_v40 = vpop.permute.xlu1 %491 }
 0x152   : > { %v494_v41 = vsel %vm351_vm1, %v490_v17, %v492_v40  ;;  %v500_v42 = vadd.f32 %v492_v40, %v476_v37 }
 0x153   : > { %v499_v43 = vadd.f32 %v494_v41, %v475_v38 }
 0x154   : > { %v520_v46 = vmul.f32 %v512_v39, %v500_v42 }
 0x155   : > { %v519_v47 = vmul.f32 %v514_v44, %v499_v43 }
 0x156   : > { %528 = vrot.lane.b32.xlu0 %v520_v46, %s1035_s12 }
 0x157   : > { %526 = vrot.lane.b32.xlu2 %v519_v47, %s1035_s12 }
 0x15e   : > { %560 = vperm.xlu0 %837, %v537_v24  }
 0x15f   : > { %550 = vperm.xlu2 %836, %v537_v24  }
 0x166   : > { %841 = vset.pattern.permute.xlu0 %v1023_v1 }
 0x167   : > { %840 = vset.pattern.permute.xlu2 %v1023_v1 }
 0x168   : > { %582 = vperm.xlu2 %840, %v579_v5  }
 0x1a7   : > { %v433_v20 = vpop.permute.xlu2 %432 }
 0x1a9   : > { %v431_v12 = vpop.permute.xlu1 %430 }
 0x1aa   : > { %v437_v53 = vsel %vm436_vm3, %v431_v12, %v433_v20 }
 0x1ab   : > { %v441_v57 = vadd.f32 %v437_v53, %v365_v55 }
 0x1b1   : > { %v525_v48 = vpop.permute.xlu1 %524  ;;  %v527_v51 = vpop.permute.xlu2 %526 }
 0x1b2   : > { %v531_v56 = vsel %vm530_vm4, %v525_v48, %v527_v51 }
 0x1b3   : > { %v535_v61 = vadd.f32 %v531_v56, %v441_v57 }
 0x1b5   : > { %v543_v4 = vperm.slane %v535_v61, 0  ;;  %v553_v6 = vperm.slane %v535_v61, 1  ;;  %v563_v14 = vperm.slane %v535_v61, 2  ;;  %v573_v21 = vperm.slane %v535_v61, 3 }
 0x1b9   : > { %v541_v58 = vpop.permute.xlu1 %540  ;;  %v551_v35 = vpop.permute.xlu2 %550 }
 0x1ba   : > { %v545_v9 = vmul.f32 %v543_v4, %v541_v58  ;;  %v555_v59 = vmul.f32 %v553_v6, %v551_v35 }
 0x1bc   : > { %v557_v19 = vadd.f32 %v555_v59, %v545_v9 }
 0x1be   : > { %v435_v52 = vpop.permute.xlu0 %434 }
 0x1bf   : > { %v438_v1 = vsel %vm436_vm3, %v433_v20, %v435_v52 }
 0x1c0   : > { %v442_v62 = vadd.f32 %v438_v1, %v366_v60 }
 0x1c2   : > { %v571_v0 = vpop.permute.xlu1 %570  ;;  %v583_v13 = vpop.permute.xlu2 %582 }
 0x1c3   : > { %v575_v24 = vmul.f32 %v573_v21, %v571_v0 }
 0x1c8   : > { %v529_v63 = vpop.permute.xlu0 %528 }
 0x1c9   : > { %v532_v2 = vsel %vm530_vm4, %v527_v51, %v529_v63 }
 0x1ca   : > { %v536_v3 = vadd.f32 %v532_v2, %v442_v62 }
 0x1cc   : > { %v544_v7 = vperm.slane %v536_v3, 0  ;;  %v554_v8 = vperm.slane %v536_v3, 1  ;;  %v564_v15 = vperm.slane %v536_v3, 2  ;;  %v574_v16 = vperm.slane %v536_v3, 3 }
 0x1ce   : > { %v546_v10 = vmul.f32 %v544_v7, %v541_v58  ;;  %v556_v11 = vmul.f32 %v554_v8, %v551_v35  ;;  %v576_v27 = vmul.f32 %v574_v16, %v571_v0 }
 0x1d0   : > { %v558_v17 = vadd.f32 %v556_v11, %v546_v10  ;;  %v561_v18 = vpop.permute.xlu0 %560 }
 0x1d1   : > { %v565_v22 = vmul.f32 %v563_v14, %v561_v18  ;;  %v566_v23 = vmul.f32 %v564_v15, %v561_v18 }
 0x1d3   : > { %v567_v25 = vadd.f32 %v565_v22, %v557_v19  ;;  %v568_v26 = vadd.f32 %v566_v23, %v558_v17 }
 0x1d5   : > { %v577_v28 = vadd.f32 %v575_v24, %v567_v25  ;;  %v578_v29 = vadd.f32 %v576_v27, %v568_v26 }
 0x1d7   : > { %v585_v30 = vadd.f32 %v583_v13, %v577_v28  ;;  %v586_v31 = vadd.f32 %v583_v13, %v578_v29 }
 0x1d9   : > { %v587_v32 = vmax.f32 %v585_v30, 0.0  ;;  %v588_v33 = vmax.f32 %v586_v31, 0.0 }
 0x1db   : > { %589 = vst [vmem:[%s293_s8] sm:$0xff] %v587_v32 }
 0x1dc   : > { %590 = vst [vmem:[%s293_s8 + $0x8] sm:$0xff] %v588_v33 }
 0x1dd   : > { %959 = shalt.err (!%p956_p0)
}
 0x1de   : > { %742 = dma.vmem_to_hbm [thread:$0]  (%p1145_p7), %s608_s30, 256, %s610_s26, %s592_s21  }
 0x1df PF: > { %s621_s25 = sand.u32 1, %s998_s18   ;;  %p756_p3 = pnand %p717_p9, %p1115_p6 }
 0x1e0   : > { %s622_s15 = scalar_lea.sflag [#allocation4], %s621_s25 }
 0x1e1   : > { %p757_p5 = pneg %p756_p3 }
 0x1e3   : > { %993 = dma.done.wait (%p757_p5), %s622_s15, 256  }
 0x1e4   : > { %995 = vsyncadd (%p757_p5), %s622_s15, 4294967040  ;;  %s22_s23 = sadd.s32 1, %s1018_s23   ;;  %s1323_s18 = smov %s1002_s19 }
 0x1e5   : > { %p19_p10 = scmp.ge.s32.totalorder %s22_s23, 4   ;;  %s1324_s19 = smov %s1006_s20 }
 0x1e6   : > { %s1325_s20 = smov %s1153_s7  ;;  %s1326_s21 = smov %s1014_s22 }
 0x1e7   : > { %s1327_s22 = smov %s1329_s16  ;;  %21 = sbr.rel (!%p19_p10) target bundleno = 7 (0x7), region = 94 }
 0x1ec   :  { %628 = vsyncpa [#allocation3], 1 }
 0x1ed   :  { %630 = vsyncpa [#allocation3 + $0x1], 1 }
 0x1ee   :  { %631 = vsyncpa [#allocation6], 1 }
 0x1ef   :  { %632 = vsyncpa [#allocation4], 1 }
 0x1f0   :  { %634 = vsyncpa [#allocation4 + $0x1], 1 }

</bundles_post_ra>
